<compile_context>
chip_gen: v5e
topology: v5e:2x2
jax: 0.10.0
libtpu: 0.0.40
codegen_flags: <defaults>
</compile_context>

<pallas_src>
import math

import jax
import jax.numpy as jnp
from jax import lax
from jax.experimental import pallas as pl
from jax.experimental.pallas import tpu as pltpu


def _gelu_exact(x):
    # nn.GELU() default is the exact (erf-based) GELU; computed in f32.
    return 0.5 * x * (1.0 + lax.erf(x * (1.0 / math.sqrt(2.0))))


def _gelu_tanh(x):
    # tanh approximation (EUP slot) -- numerics differ slightly from exact erf.
    c = math.sqrt(2.0 / math.pi)
    return 0.5 * x * (1.0 + jnp.tanh(c * (x + 0.044715 * x * x * x)))


def _round_up(a, b):
    return ((a + b - 1) // b) * b


def _chip_config():
    """(vmem_capacity_bytes, mxu_alignment, tensorcores_per_chip)."""
    vmem_cap = 64 * 1024 * 1024          # conservative fallback (v7x-sized)
    try:
        vmem_cap = int(pltpu.get_tpu_info().vmem_capacity_bytes)
    except Exception:
        pass
    kind = ""
    try:
        kind = jax.devices()[0].device_kind.lower()
    except Exception:
        pass
    mxu_align = 256 if ("v6" in kind or "v7" in kind) else 128   # 2x256x256 vs 4x128x128
    num_cores = 2 if "v7" in kind else 1                         # v7x: 2 TCs/chip
    return vmem_cap, mxu_align, num_cores


def _make_ffn_kernel(use_tanh_gelu):
    def ffn_kernel(x_ref, w1_ref, b1_ref, w2_ref, b2_ref, o_ref, acc_ref):
        # x_ref:  (TM, Ep)   w1_ref: (Ep, TI)  b1_ref: (1, I_p)  (whole bias)
        # w2_ref: (TI, TE)   b2_ref: (1, TE)   o_ref:  (TM, TE)
        # acc_ref: (TM, TE) f32 accumulator, resident across the I ("arbitrary") axis.
        k = pl.program_id(2)

        @pl.when(k == 0)
        def _():
            acc_ref[...] = jnp.zeros_like(acc_ref)

        ti = w1_ref.shape[1]
        # Native-dtype MXU matmuls with f32 accumulation (no operand upcasts).
        h = jnp.dot(x_ref[...], w1_ref[...], preferred_element_type=jnp.float32)
        start = pl.multiple_of(k * ti, 128)
        h = h + b1_ref[:, pl.ds(start, ti)].astype(jnp.float32)   # (1, TI) -> (TM, TI)
        h = _gelu_tanh(h) if use_tanh_gelu else _gelu_exact(h)
        acc_ref[...] += jnp.dot(h.astype(w2_ref.dtype), w2_ref[...],
                                preferred_element_type=jnp.float32)

        @pl.when(k == pl.num_programs(2) - 1)
        def _():
            y = acc_ref[...] + b2_ref[...].astype(jnp.float32)
            # Dropout (eval mode) == identity.
            o_ref[...] = y.astype(o_ref.dtype)

    return ffn_kernel


def feed_forward(x, w1, b1, w2, b2, *, tile_m=None, tile_i=None, tile_e=None,
                 vmem_budget_bytes=None, use_tanh_gelu=False):
    """x: (batch, seq, E). w1: (E, I), b1: (I,), w2: (I, E), b2: (E,).

    Weights are stored already-transposed, i.e. (in_features, out_features).
    Pass tile_m / tile_i / tile_e to override the automatic selection.
    """
    batch, seq, E = x.shape
    assert w1.shape[0] == E
    I = w1.shape[1]
    assert b1.shape == (I,) and w2.shape == (I, E) and b2.shape == (E,)

    M = batch * seq
    x2d = x.reshape(M, E)

    x_bytes = jnp.dtype(x.dtype).itemsize
    w_bytes = jnp.dtype(w1.dtype).itemsize

    vmem_cap, mxu_align, num_cores = _chip_config()
    if vmem_budget_bytes is None:
        # ~105 MiB on 128-MiB chips (v5e/v6e), ~52 MiB on 64-MiB v7x; headroom is
        # left for Mosaic internal scratch (erf temps, DMA descriptors).
        vmem_budget_bytes = max(16 * 2**20,
                                min(vmem_cap - 12 * 2**20, int(vmem_cap * 0.82)))
    budget = int(vmem_budget_bytes)

    # ---- embedding (lane / output) axis -----------------------------------
    E128 = _round_up(E, 128)
    # 256-align E on 256x256-MXU chips when it is already >= 256 wide.
    E_base = _round_up(E, 256) if (mxu_align == 256 and E128 >= 256) else E128
    if tile_e is None:
        te = E_base if E_base <= 4096 else 2048   # E-tiling only for very large E
    else:
        te = max(128, _round_up(tile_e, 128))
    E_p = _round_up(E_base, te)

    # ---- intermediate (contraction) axis -----------------------------------
    I128 = _round_up(I, 128)
    if tile_i is None:
        ti = min(I128, 1024)
        i_floor = min(mxu_align, I128)   # never starve the 256x256 MXU on v6e/v7x
    else:
        ti = max(128, _round_up(tile_i, 128))
        i_floor = ti

    # ---- row (M) axis: grow tile_m as large as the budget allows -----------
    M8 = _round_up(M, 8)
    if num_cores >= 2 and M8 >= 16:
        m_cap = _round_up(M8 // 2, 8)    # >= 2 row tiles so both v7x TCs get work
    else:
        m_cap = M8

    def _tm_for(ti_):
        ip_ = _round_up(I, ti_)
        const = (2 * E_p * ti_ * w_bytes     # W1 chunk   (double buffered)
                 + 2 * 8 * ip_ * w_bytes     # whole b1   (sublane-padded to 8)
                 + 2 * ti_ * te * w_bytes    # W2 chunk   (double buffered)
                 + 2 * 8 * te * w_bytes)     # b2         (sublane-padded)
        per_row = (2 * E_p * x_bytes         # x tile     (double buffered)
                   + 2 * te * x_bytes        # out tile   (double buffered)
                   + te * 4                  # f32 accumulator scratch
                   + 2 * ti_ * 4)            # f32 GELU intermediate + erf temps
        return (budget - const) // per_row

    if tile_m is None:
        # Prefer a large tile_m (each doubling halves W1/W2 HBM re-reads); only
        # shrink tile_i toward the MXU floor if even tile_m=8 does not fit.
        while _tm_for(ti) < 8 and ti > i_floor:
            ti = max(i_floor, _round_up(ti // 2, 128))
        tm = int(max(8, min((_tm_for(ti) // 8) * 8, m_cap)))
    else:
        tm = max(8, _round_up(tile_m, 8))

    I_p = _round_up(I, ti)
    M_p = _round_up(M, tm)

    # Zero padding is mathematically inert: padded x columns / W1 rows and padded
    # W2 rows contribute nothing; padded output rows/cols are sliced off.
    # (In a real model, pad the weights once at parameter init, not per call.)
    xp = x2d if (M_p == M and E_p == E) else jnp.pad(x2d, ((0, M_p - M), (0, E_p - E)))
    w1p = w1 if (E_p == E and I_p == I) else jnp.pad(w1, ((0, E_p - E), (0, I_p - I)))
    b1p = (b1 if I_p == I else jnp.pad(b1, ((0, I_p - I),))).reshape(1, I_p)
    w2p = w2 if (I_p == I and E_p == E) else jnp.pad(w2, ((0, I_p - I), (0, E_p - E)))
    b2p = (b2 if E_p == E else jnp.pad(b2, ((0, E_p - E),))).reshape(1, E_p)

    grid = (M_p // tm, E_p // te, I_p // ti)
    vmem_limit = int(min(vmem_cap, budget + 8 * 2**20))

    out = pl.pallas_call(
        _make_ffn_kernel(use_tanh_gelu),
        out_shape=jax.ShapeDtypeStruct((M_p, E_p), x.dtype),
        grid_spec=pltpu.PrefetchScalarGridSpec(
            num_scalar_prefetch=0,
            grid=grid,
            in_specs=[
                pl.BlockSpec((tm, E_p), lambda i, j, k: (i, 0)),    # x rows (full E)
                pl.BlockSpec((E_p, ti), lambda i, j, k: (0, k)),    # W1 chunk
                pl.BlockSpec((1, I_p), lambda i, j, k: (0, 0)),     # whole b1, sliced in-kernel
                pl.BlockSpec((ti, te), lambda i, j, k: (k, j)),     # W2 chunk
                pl.BlockSpec((1, te), lambda i, j, k: (0, j)),      # b2 slice
            ],
            out_specs=pl.BlockSpec((tm, te), lambda i, j, k: (i, j)),
            scratch_shapes=[pltpu.VMEM((tm, te), jnp.float32)],
        ),
        compiler_params=pltpu.CompilerParams(
            dimension_semantics=("parallel", "parallel", "arbitrary"),
            vmem_limit_bytes=vmem_limit,
        ),
    )(xp, w1p, b1p, w2p, b2p)

    return out[:M, :E].reshape(batch, seq, E)


def feed_forward_reference(x, w1, b1, w2, b2):
    h = jnp.dot(x, w1) + b1
    h = _gelu_exact(h)
    return jnp.dot(h, w2) + b2


def _init_params(key, E, I, dtype=jnp.float32):
    # nn.Linear-style uniform(-1/sqrt(fan_in), 1/sqrt(fan_in)); weights stored
    # as (in_features, out_features) = W.T relative to PyTorch's (out, in).
    kw1, kb1, kw2, kb2 = jax.random.split(key, 4)
    lim1 = 1.0 / math.sqrt(E)
    lim2 = 1.0 / math.sqrt(I)
    w1 = jax.random.uniform(kw1, (E, I), dtype, -lim1, lim1)
    b1 = jax.random.uniform(kb1, (I,), dtype, -lim1, lim1)
    w2 = jax.random.uniform(kw2, (I, E), dtype, -lim2, lim2)
    b2 = jax.random.uniform(kb2, (E,), dtype, -lim2, lim2)
    return w1, b1, w2, b2


if __name__ == "__main__":
    key = jax.random.PRNGKey(0)

    # Case 1: config-sized smoke test (embedding_dimensions=32, intermediate_size=128),
    # fully automatic tile selection.
    batch, seq, E, I = 2, 8, 32, 128
    k1, k2, k3 = jax.random.split(key, 3)
    x = jax.random.normal(k1, (batch, seq, E), dtype=jnp.float32)
    w1, b1, w2, b2 = _init_params(k2, E, I)

    out = jax.block_until_ready(feed_forward(x, w1, b1, w2, b2))
    ref = feed_forward_reference(x, w1, b1, w2, b2)
    assert out.shape == (batch, seq, E)
    assert jnp.allclose(out, ref, atol=1e-5, rtol=1e-5), "case 1 mismatch vs reference"

    # Case 2: ragged shapes exercising M/E/I padding with a multi-step grid on the
    # "parallel" M axis and the "arbitrary" I axis.
    batch2, seq2, E2, I2 = 3, 37, 48, 200
    k4, k5, k6 = jax.random.split(k3, 3)
    x2 = jax.random.normal(k4, (batch2, seq2, E2), dtype=jnp.float32)
    p2 = _init_params(k5, E2, I2)

    out2 = jax.block_until_ready(feed_forward(x2, *p2, tile_m=16, tile_i=128))
    ref2 = feed_forward_reference(x2, *p2)
    assert out2.shape == (batch2, seq2, E2)
    assert jnp.allclose(out2, ref2, atol=1e-4, rtol=1e-4), "case 2 mismatch vs reference"

    # Case 3: exercise the E (output) tiling axis and multi-chunk in-kernel b1 slicing.
    batch3, seq3, E3, I3 = 2, 16, 160, 320
    k7, k8 = jax.random.split(k6, 2)
    x3 = jax.random.normal(k7, (batch3, seq3, E3), dtype=jnp.float32)
    p3 = _init_params(k8, E3, I3)

    out3 = jax.block_until_ready(
        feed_forward(x3, *p3, tile_m=16, tile_i=128, tile_e=128))
    ref3 = feed_forward_reference(x3, *p3)
    assert out3.shape == (batch3, seq3, E3)
    assert jnp.allclose(out3, ref3, atol=1e-4, rtol=1e-4), "case 3 mismatch vs reference"

    print("KERNEL_OK")
</pallas_src>

<mosaic_0001>
module attributes {stable_mosaic.version = 11 : i64} {
  func.func @ffn_kernel(%arg0: i32, %arg1: i32, %arg2: i32, %arg3: memref<16x128xf32, #tpu.memory_space<vmem>>, %arg4: memref<128x128xf32, #tpu.memory_space<vmem>>, %arg5: memref<1x128xf32, #tpu.memory_space<vmem>>, %arg6: memref<128x128xf32, #tpu.memory_space<vmem>>, %arg7: memref<1x128xf32, #tpu.memory_space<vmem>>, %arg8: memref<16x128xf32, #tpu.memory_space<vmem>>, %arg9: memref<16x128xf32, #tpu.memory_space<vmem>>) attributes {dimension_semantics = [#tpu.dimension_semantics<parallel>, #tpu.dimension_semantics<parallel>, #tpu.dimension_semantics<arbitrary>], iteration_bounds = array<i64: 1, 1, 1>, scalar_prefetch = 0 : i64, scratch_operands = 1 : i64, tpu.core_type = #tpu.core_type<tc>, window_params = [{transform_indices = @transform_0, window_bounds = array<i64: 16, 128>}, {transform_indices = @transform_1, window_bounds = array<i64: 128, 128>}, {pipeline_mode = #tpu.pipeline_mode<synchronous>, transform_indices = @transform_2, window_bounds = array<i64: 1, 128>}, {transform_indices = @transform_3, window_bounds = array<i64: 128, 128>}, {transform_indices = @transform_4, window_bounds = array<i64: 1, 128>}, {transform_indices = @transform_5, window_bounds = array<i64: 16, 128>}]} {
    %c0_i32 = arith.constant 0 : i32
    %0 = arith.cmpi eq, %arg2, %c0_i32 : i32
    %1 = arith.extui %0 : i1 to i32
    %c0_i32_0 = arith.constant 0 : i32
    %2 = arith.cmpi ne, %1, %c0_i32_0 : i32
    scf.if %2 {
      %cst_17 = arith.constant 0.000000e+00 : f32
      %28 = vector.broadcast %cst_17 : f32 to vector<16x128xf32>
      %c0_18 = arith.constant 0 : index
      %c0_19 = arith.constant 0 : index
      %29 = vector.load %arg9[%c0_18, %c0_19] : memref<16x128xf32, #tpu.memory_space<vmem>>, vector<16x128xf32>
      tpu.vector_store %arg9[%c0_18, %c0_19], %28 {strides = array<i32>} : memref<16x128xf32, #tpu.memory_space<vmem>>, vector<16x128xf32>,
    } else {
    }
    %c0 = arith.constant 0 : index
    %c0_1 = arith.constant 0 : index
    %3 = vector.load %arg3[%c0, %c0_1] : memref<16x128xf32, #tpu.memory_space<vmem>>, vector<16x128xf32>
    %c0_2 = arith.constant 0 : index
    %c0_3 = arith.constant 0 : index
    %4 = vector.load %arg4[%c0_2, %c0_3] : memref<128x128xf32, #tpu.memory_space<vmem>>, vector<128x128xf32>
    %cst = arith.constant dense<0.000000e+00> : vector<16x128xf32>
    %5 = tpu.matmul %3, %4, %cst {dimension_numbers = #tpu.dot_dimension_numbers<[1], [0], [0], [1], [0, 0, 1, 1], [], []>} : vector<16x128xf32>, vector<128x128xf32>, vector<16x128xf32> -> vector<16x128xf32>
    %c128_i32 = arith.constant 128 : i32
    %6 = arith.muli %arg2, %c128_i32 : i32
    %7 = tpu.assume_multiple %6, 128 : i32
    %c0_4 = arith.constant 0 : index
    %8 = arith.index_cast %7 : i32 to index
    %9 = vector.load %arg5[%c0_4, %8] : memref<1x128xf32, #tpu.memory_space<vmem>>, vector<1x128xf32>
    %10 = vector.broadcast %9 : vector<1x128xf32> to vector<16x128xf32>
    %11 = arith.addf %5, %10 : vector<16x128xf32>
    %cst_5 = arith.constant 5.000000e-01 : f32
    %12 = vector.broadcast %cst_5 : f32 to vector<16x128xf32>
    %13 = arith.mulf %12, %11 : vector<16x128xf32>
    %cst_6 = arith.constant 0.707106769 : f32
    %14 = vector.broadcast %cst_6 : f32 to vector<16x128xf32>
    %15 = arith.mulf %11, %14 : vector<16x128xf32>
    %16 = math.erf %15 : vector<16x128xf32>
    %cst_7 = arith.constant 1.000000e+00 : f32
    %17 = vector.broadcast %cst_7 : f32 to vector<16x128xf32>
    %18 = arith.addf %17, %16 : vector<16x128xf32>
    %19 = arith.mulf %13, %18 : vector<16x128xf32>
    %c0_8 = arith.constant 0 : index
    %c0_9 = arith.constant 0 : index
    %20 = vector.load %arg9[%c0_8, %c0_9] : memref<16x128xf32, #tpu.memory_space<vmem>>, vector<16x128xf32>
    %c0_10 = arith.constant 0 : index
    %c0_11 = arith.constant 0 : index
    %21 = vector.load %arg6[%c0_10, %c0_11] : memref<128x128xf32, #tpu.memory_space<vmem>>, vector<128x128xf32>
    %cst_12 = arith.constant dense<0.000000e+00> : vector<16x128xf32>
    %22 = tpu.matmul %19, %21, %cst_12 {dimension_numbers = #tpu.dot_dimension_numbers<[1], [0], [0], [1], [0, 0, 1, 1], [], []>} : vector<16x128xf32>, vector<128x128xf32>, vector<16x128xf32> -> vector<16x128xf32>
    %23 = arith.addf %20, %22 : vector<16x128xf32>
    %c0_13 = arith.constant 0 : index
    %c0_14 = arith.constant 0 : index
    %24 = vector.load %arg9[%c0_13, %c0_14] : memref<16x128xf32, #tpu.memory_space<vmem>>, vector<16x128xf32>
    tpu.vector_store %arg9[%c0_13, %c0_14], %23 {strides = array<i32>} : memref<16x128xf32, #tpu.memory_space<vmem>>, vector<16x128xf32>,
    %c0_i32_15 = arith.constant 0 : i32
    %25 = arith.cmpi eq, %arg2, %c0_i32_15 : i32
    %26 = arith.extui %25 : i1 to i32
    %c0_i32_16 = arith.constant 0 : i32
    %27 = arith.cmpi ne, %26, %c0_i32_16 : i32
    scf.if %27 {
      %c0_17 = arith.constant 0 : index
      %c0_18 = arith.constant 0 : index
      %28 = vector.load %arg9[%c0_17, %c0_18] : memref<16x128xf32, #tpu.memory_space<vmem>>, vector<16x128xf32>
      %c0_19 = arith.constant 0 : index
      %c0_20 = arith.constant 0 : index
      %29 = vector.load %arg7[%c0_19, %c0_20] : memref<1x128xf32, #tpu.memory_space<vmem>>, vector<1x128xf32>
      %30 = vector.broadcast %29 : vector<1x128xf32> to vector<16x128xf32>
      %31 = arith.addf %28, %30 : vector<16x128xf32>
      %c0_21 = arith.constant 0 : index
      %c0_22 = arith.constant 0 : index
      %32 = vector.load %arg8[%c0_21, %c0_22] : memref<16x128xf32, #tpu.memory_space<vmem>>, vector<16x128xf32>
      tpu.vector_store %arg8[%c0_21, %c0_22], %31 {strides = array<i32>} : memref<16x128xf32, #tpu.memory_space<vmem>>, vector<16x128xf32>,
    } else {
    }
    return
  }
  func.func @transform_0(%arg0: i32, %arg1: i32, %arg2: i32) -> (i32, i32) {
    %c0_i32 = arith.constant 0 : i32
    %c0_i32_0 = arith.constant 0 : i32
    return %arg0, %c0_i32 : i32, i32
  }
  func.func @transform_1(%arg0: i32, %arg1: i32, %arg2: i32) -> (i32, i32) {
    %c0_i32 = arith.constant 0 : i32
    %c0_i32_0 = arith.constant 0 : i32
    return %c0_i32, %arg2 : i32, i32
  }
  func.func @transform_2(%arg0: i32, %arg1: i32, %arg2: i32) -> (i32, i32) {
    %c0_i32 = arith.constant 0 : i32
    %c0_i32_0 = arith.constant 0 : i32
    %c0_i32_1 = arith.constant 0 : i32
    return %c0_i32, %c0_i32_0 : i32, i32
  }
  func.func @transform_3(%arg0: i32, %arg1: i32, %arg2: i32) -> (i32, i32) {
    %c0_i32 = arith.constant 0 : i32
    return %arg2, %arg1 : i32, i32
  }
  func.func @transform_4(%arg0: i32, %arg1: i32, %arg2: i32) -> (i32, i32) {
    %c0_i32 = arith.constant 0 : i32
    %c0_i32_0 = arith.constant 0 : i32
    return %c0_i32, %arg1 : i32, i32
  }
  func.func @transform_5(%arg0: i32, %arg1: i32, %arg2: i32) -> (i32, i32) {
    %c0_i32 = arith.constant 0 : i32
    return %arg0, %arg1 : i32, i32
  }
}

</mosaic_0001>

<bundles_post_ra>
// kernel: tpu_custom_call.1
= control target key start
LH: loop header
LB: loop body
LE: loop exit
PB: predicated region body
PF: predicated region fallthrough
CT: control target
= control target key end

     0   :  { %10 = vsyncpa [#allocation4], 0  ;;  %s534_s0 = inlined_call_operand.hbm [shape: f32[16,128], index: 0, kind: input, shape index: {}]   ;;  %s535_s1 = inlined_call_operand.hbm [shape: f32[128,128], index: 1, kind: input, shape index: {}]   ;;  %s536_s2 = inlined_call_operand.vmem [shape: f32[1,128], index: 2, kind: input, shape index: {}]   ;;  %s537_s3 = inlined_call_operand.hbm [shape: f32[128,128], index: 3, kind: input, shape index: {}]   ;;  %s538_s4 = inlined_call_operand.vmem [shape: f32[1,128], index: 4, kind: input, shape index: {}]   ;;  %s539_s5 = inlined_call_operand.hbm [shape: f32[16,128], index: 5, kind: output, shape index: {}]  }
   0x1   :  { %11 = vsyncpa [#allocation7], 0 }
   0x2   :  { %12 = vsyncpa [#allocation5], 0  ;;  %s30_s20 = sshll.u32 %s535_s1, 4  ;;  %s438_s21 = smov [#allocation6]   ;;  %s31_s20 = int_to_ptr.hbm [resolvable:$true] %s30_s20 }
   0x3   :  { %s32_s22 = sshll.u32 %s438_s21, 4  ;;  %s17_s25 = sshll.u32 %s534_s0, 4  ;;  %s33_s22 = int_to_ptr.vmem [resolvable:$true] %s32_s22  ;;  %s18_s25 = int_to_ptr.hbm [resolvable:$true] %s17_s25 }
   0x4   :  { %s439_s26 = smov 128   ;;  %s440_s27 = smov 8  }
   0x5   :  { %38 = dma.hbm_to_vmem [thread:$0]  %s31_s20, 2048, %s33_s22, [#allocation7], %s439_s26, %s439_s26, %s440_s27  }
   0x6   :  { %s441_s28 = smov [#allocation3]   ;;  %s45_s1 = sshll.u32 %s537_s3, 4  ;;  %s46_s1 = int_to_ptr.hbm [resolvable:$true] %s45_s1 }
   0x7   :  { %s19_s29 = sshll.u32 %s441_s28, 4  ;;  %s442_s0 = smov [#allocation8]   ;;  %s20_s29 = int_to_ptr.vmem [resolvable:$true] %s19_s29 }
   0x8   :  { %25 = dma.hbm_to_vmem [thread:$0]  %s18_s25, 256, %s20_s29, [#allocation4], %s439_s26, %s439_s26, %s440_s27  }
   0x9   :  { %s47_s7 = sshll.u32 %s442_s0, 4  ;;  %s48_s7 = int_to_ptr.vmem [resolvable:$true] %s47_s7 }
   0xa   :  { %53 = dma.hbm_to_vmem [thread:$0]  %s46_s1, 2048, %s48_s7, [#allocation7], %s439_s26, %s439_s26, %s440_s27  }
   0xb   :  { %432 = dma.done.wait [#allocation4], 256  }
   0xc   :  { %433 = vsyncadd [#allocation4], 4294967040 }
   0xd   :  { %434 = dma.done.wait [#allocation7], 4096  }
   0xe   :  { %435 = vsyncadd [#allocation7], 4294963200  ;;  %v91_v0 = vld [vmem:[#allocation6 + $0x78] sm:$0xff]  ;;  %v90_v1 = vld [vmem:[#allocation6 + $0x70] sm:$0xff]  ;;  %s443_s10 = smov [#allocation9]   ;;  %s275_s14 = sshll.u32 %s539_s5, 4  ;;  %s276_s14 = int_to_ptr.hbm [resolvable:$true] %s275_s14 }
   0xf   :  { %100 = vmatpush.msra.mxu0 %v91_v0  ;;  %292 = vmatpush.msra.mxu2 %v91_v0  ;;  %v89_v2 = vld [vmem:[#allocation6 + $0x68] sm:$0xff]  ;;  %v88_v3 = vld [vmem:[#allocation6 + $0x60] sm:$0xff]  ;;  %v87_v4 = vld [vmem:[#allocation6 + $0x58] sm:$0xff]  ;;  %s273_s11 = sshll.u32 %s443_s10, 4  ;;  %s274_s11 = int_to_ptr.vmem [resolvable:$true] %s273_s11 }
  0x10   :  { %v86_v5 = vld [vmem:[#allocation6 + $0x50] sm:$0xff]  ;;  %v85_v6 = vld [vmem:[#allocation6 + $0x48] sm:$0xff]  ;;  %v84_v7 = vld [vmem:[#allocation6 + $0x40] sm:$0xff] }
  0x11   :  { %101 = vmatpush.msra.mxu0 %v90_v1  ;;  %293 = vmatpush.msra.mxu2 %v90_v1  ;;  %v83_v8 = vld [vmem:[#allocation6 + $0x38] sm:$0xff]  ;;  %v82_v9 = vld [vmem:[#allocation6 + $0x30] sm:$0xff]  ;;  %v81_v10 = vld [vmem:[#allocation6 + $0x28] sm:$0xff] }
  0x12   :  { %v80_v11 = vld [vmem:[#allocation6 + $0x20] sm:$0xff]  ;;  %v79_v12 = vld [vmem:[#allocation6 + $0x18] sm:$0xff]  ;;  %v78_v13 = vld [vmem:[#allocation6 + $0x10] sm:$0xff] }
  0x13   :  { %102 = vmatpush.msra.mxu0 %v89_v2  ;;  %294 = vmatpush.msra.mxu2 %v89_v2  ;;  %v77_v14 = vld [vmem:[#allocation6 + $0x8] sm:$0xff]  ;;  %v76_v15 = vld [vmem:[#allocation6] sm:$0xff]  ;;  %v74_v16 = vld [vmem:[#allocation3] sm:$0xff] }
  0x14   :  { %v75_v17 = vld [vmem:[#allocation3 + $0x8] sm:$0xff]  ;;  %v227_v19 = vld [vmem:[#allocation8 + $0x70] sm:$0xff]  ;;  %v226_v20 = vld [vmem:[#allocation8 + $0x68] sm:$0xff] }
  0x15   :  { %103 = vmatpush.msra.mxu0 %v88_v3  ;;  %295 = vmatpush.msra.mxu2 %v88_v3  ;;  %v228_v18 = vld [vmem:[#allocation8 + $0x78] sm:$0xff]  ;;  %v225_v21 = vld [vmem:[#allocation8 + $0x60] sm:$0xff]  ;;  %v330_v22 = vld [vmem:[%s536_s2] ss:$0 sm:$0xff] }
  0x16   :  { %229 = vmatpush.msra.mxu1 %v228_v18  ;;  %308 = vmatpush.msra.mxu3 %v228_v18  ;;  %v224_v23 = vld [vmem:[#allocation8 + $0x58] sm:$0xff]  ;;  %v223_v25 = vld [vmem:[#allocation8 + $0x50] sm:$0xff]  ;;  %v222_v27 = vld [vmem:[#allocation8 + $0x48] sm:$0xff] }
  0x17   :  { %104 = vmatpush.msra.mxu0 %v87_v4  ;;  %296 = vmatpush.msra.mxu2 %v87_v4  ;;  %v221_v29 = vld [vmem:[#allocation8 + $0x40] sm:$0xff]  ;;  %v220_v30 = vld [vmem:[#allocation8 + $0x38] sm:$0xff]  ;;  %v219_v33 = vld [vmem:[#allocation8 + $0x30] sm:$0xff] }
  0x18   :  { %230 = vmatpush.msra.mxu1 %v227_v19  ;;  %309 = vmatpush.msra.mxu3 %v227_v19  ;;  %v218_v36 = vld [vmem:[#allocation8 + $0x28] sm:$0xff]  ;;  %v217_v39 = vld [vmem:[#allocation8 + $0x20] sm:$0xff]  ;;  %v216_v43 = vld [vmem:[#allocation8 + $0x18] sm:$0xff] }
  0x19   :  { %105 = vmatpush.msra.mxu0 %v86_v5  ;;  %297 = vmatpush.msra.mxu2 %v86_v5  ;;  %v215_v47 = vld [vmem:[#allocation8 + $0x10] sm:$0xff]  ;;  %v214_v52 = vld [vmem:[#allocation8 + $0x8] sm:$0xff]  ;;  %v213_v56 = vld [vmem:[#allocation8] sm:$0xff] }
  0x1a   :  { %231 = vmatpush.msra.mxu1 %v226_v20  ;;  %310 = vmatpush.msra.mxu3 %v226_v20 }
  0x1b   :  { %106 = vmatpush.msra.mxu0 %v85_v6  ;;  %298 = vmatpush.msra.mxu2 %v85_v6 }
  0x1c   :  { %232 = vmatpush.msra.mxu1 %v225_v21  ;;  %311 = vmatpush.msra.mxu3 %v225_v21 }
  0x1d   :  { %107 = vmatpush.msra.mxu0 %v84_v7  ;;  %299 = vmatpush.msra.mxu2 %v84_v7 }
  0x1e   :  { %233 = vmatpush.msra.mxu1 %v224_v23  ;;  %312 = vmatpush.msra.mxu3 %v224_v23 }
  0x1f   :  { %108 = vmatpush.msra.mxu0 %v83_v8  ;;  %300 = vmatpush.msra.mxu2 %v83_v8 }
  0x20   :  { %234 = vmatpush.msra.mxu1 %v223_v25  ;;  %313 = vmatpush.msra.mxu3 %v223_v25 }
  0x21   :  { %109 = vmatpush.msra.mxu0 %v82_v9  ;;  %301 = vmatpush.msra.mxu2 %v82_v9 }
  0x22   :  { %235 = vmatpush.msra.mxu1 %v222_v27  ;;  %314 = vmatpush.msra.mxu3 %v222_v27 }
  0x23   :  { %110 = vmatpush.msra.mxu0 %v81_v10  ;;  %302 = vmatpush.msra.mxu2 %v81_v10 }
  0x24   :  { %236 = vmatpush.msra.mxu1 %v221_v29  ;;  %315 = vmatpush.msra.mxu3 %v221_v29 }
  0x25   :  { %111 = vmatpush.msra.mxu0 %v80_v11  ;;  %303 = vmatpush.msra.mxu2 %v80_v11 }
  0x26   :  { %237 = vmatpush.msra.mxu1 %v220_v30  ;;  %316 = vmatpush.msra.mxu3 %v220_v30 }
  0x27   :  { %112 = vmatpush.msra.mxu0 %v79_v12  ;;  %304 = vmatpush.msra.mxu2 %v79_v12 }
  0x28   :  { %238 = vmatpush.msra.mxu1 %v219_v33  ;;  %317 = vmatpush.msra.mxu3 %v219_v33 }
  0x29   :  { %113 = vmatpush.msra.mxu0 %v78_v13  ;;  %305 = vmatpush.msra.mxu2 %v78_v13 }
  0x2a   :  { %239 = vmatpush.msra.mxu1 %v218_v36  ;;  %318 = vmatpush.msra.mxu3 %v218_v36 }
  0x2b   :  { %114 = vmatpush.msra.mxu0 %v77_v14  ;;  %306 = vmatpush.msra.mxu2 %v77_v14 }
  0x2c   :  { %240 = vmatpush.msra.mxu1 %v217_v39  ;;  %319 = vmatpush.msra.mxu3 %v217_v39 }
  0x2d   :  { %115 = vmatpush.msra.mxu0 %v76_v15  ;;  %307 = vmatpush.msra.mxu2 %v76_v15 }
  0x2e   :  { %116 = vmatmul.f32.vlgmr.msra.gmra.mxu0 %v74_v16  ;;  %119 = vmatmul.f32.vlgmr.msra.gmra.mxu2 %v75_v17 }
  0x2f   :  { %241 = vmatpush.msra.mxu1 %v216_v43  ;;  %320 = vmatpush.msra.mxu3 %v216_v43 }
  0x31   :  { %242 = vmatpush.msra.mxu1 %v215_v47  ;;  %321 = vmatpush.msra.mxu3 %v215_v47 }
  0x33   :  { %243 = vmatpush.msra.mxu1 %v214_v52  ;;  %322 = vmatpush.msra.mxu3 %v214_v52 }
  0x35   :  { %244 = vmatpush.msra.mxu1 %v213_v56  ;;  %323 = vmatpush.msra.mxu3 %v213_v56  ;;  %v331_v56 = vld [vmem:[%s538_s4] ss:$0 sm:$0xff] }
  0xab   :  { %v117_v24 = vpop.f32.mrf.mxu0 }
  0xac   :  { %v495_v26 = vadd.f32 %v330_v22, %v117_v24 }
  0xae   :  { %v498_v28 = vmul.f32 0.70710677, %v495_v26  ;;  %v123_v47 = vmul.f32 0.5, %v495_v26 }
  0xb0   :  { %v127_v31 = vmul.f32 %v498_v28, %v498_v28 }
  0xb1   :  { %v120_v32 = vpop.f32.mrf.mxu2 }
  0xb2   :  { %v502_v34 = vmin.f32 %v127_v31, 16.0  ;;  %v504_v35 = vadd.f32 %v330_v22, %v120_v32 }
  0xb4   :  { %v129_v37 = vmul.f32 2.1237322e-06, %v502_v34  ;;  %v508_v38 = vmul.f32 0.70710677, %v504_v35  ;;  %v140_v40 = vmul.f32 3.8918573e-05, %v502_v34 }
  0xb6   :  { %v130_v41 = vadd.f32 0.00028619796, %v129_v37  ;;  %v167_v42 = vmul.f32 %v508_v38, %v508_v38  ;;  %v141_v44 = vadd.f32 0.001143296, %v140_v40 }
  0xb8   :  { %v131_v45 = vmul.f32 %v130_v41, %v502_v34  ;;  %v168_v46 = vmin.f32 %v167_v42, 16.0  ;;  %v142_v48 = vmul.f32 %v141_v44, %v502_v34 }
  0xba   :  { %v169_v49 = vmul.f32 2.1237322e-06, %v168_v46  ;;  %v180_v50 = vmul.f32 3.8918573e-05, %v168_v46  ;;  %v132_v51 = vadd.f32 0.0036580483, %v131_v45 }
  0xbb   :  { %v143_v53 = vadd.f32 0.014752088, %v142_v48 }
  0xbc   :  { %v170_v54 = vadd.f32 0.00028619796, %v169_v49  ;;  %v181_v55 = vadd.f32 0.001143296, %v180_v50  ;;  %v133_v60 = vmul.f32 %v132_v51, %v502_v34 }
  0xbd   :  { %v144_v57 = vmul.f32 %v143_v53, %v502_v34  ;;  %v124_v53 = vmul.f32 0.5, %v504_v35 }
  0xbe   :  { %v171_v58 = vmul.f32 %v170_v54, %v168_v46  ;;  %v182_v59 = vmul.f32 %v181_v55, %v168_v46  ;;  %v134_v2 = vadd.f32 0.05243302, %v133_v60 }
  0xbf   :  { %v145_v61 = vadd.f32 0.112945676, %v144_v57 }
  0xc0   :  { %v172_v62 = vadd.f32 0.0036580483, %v171_v58  ;;  %v183_v63 = vadd.f32 0.014752088, %v182_v59  ;;  %v135_v8 = vmul.f32 %v134_v2, %v502_v34 }
  0xc1   :  { %v146_v0 = vmul.f32 %v145_v61, %v502_v34 }
  0xc2   :  { %v184_v1 = vmul.f32 %v183_v63, %v168_v46  ;;  %v173_v4 = vmul.f32 %v172_v62, %v168_v46  ;;  %v136_v13 = vadd.f32 0.18741608, %v135_v8 }
  0xc3   :  { %v147_v3 = vadd.f32 0.4994258, %v146_v0 }
  0xc4   :  { %v185_v5 = vadd.f32 0.112945676, %v184_v1  ;;  %v174_v10 = vadd.f32 0.05243302, %v173_v4  ;;  %v137_v17 = vmul.f32 %v136_v13, %v502_v34 }
  0xc5   :  { %v148_v6 = vmul.f32 %v147_v3, %v502_v34 }
  0xc6   :  { %v186_v7 = vmul.f32 %v185_v5, %v168_v46  ;;  %v175_v14 = vmul.f32 %v174_v10, %v168_v46  ;;  %v138_v21 = vadd.f32 1.1283791, %v137_v17 }
  0xc7   :  { %v149_v9 = vadd.f32 1.0, %v148_v6 }
  0xc8   :  { %v187_v11 = vadd.f32 0.4994258, %v186_v7  ;;  %v176_v18 = vadd.f32 0.18741608, %v175_v14  ;;  %v139_v31 = vmul.f32 %v138_v21, %v498_v28 }
  0xc9   :  { %332 = vrcp.f32 %v149_v9  ;;  %v161_v22 = vand.u32 2147483648, %v149_v9  ;;  %v159_v27 = vand.u32 2147483647, %v149_v9  ;;  %vm155_vm1 = vweird.f32 %v149_v9 }
  0xca   :  { %v188_v12 = vmul.f32 %v187_v11, %v168_v46  ;;  %v177_v24 = vmul.f32 %v176_v18, %v168_v46 }
  0xcb   :  { %v162_v32 = vor.u32 1.1754944e-38, %v161_v22  ;;  %vm160_vm3 = vcmp.eq.f32.partialorder %v159_v27, 8.507059e+37 }
  0xcc   :  { %v189_v15 = vadd.f32 1.0, %v188_v12  ;;  %v178_v36 = vadd.f32 1.1283791, %v177_v24 }
  0xce   :  { %334 = vrcp.f32 %v189_v15  ;;  %v201_v37 = vand.u32 2147483648, %v189_v15  ;;  %v199_v41 = vand.u32 2147483647, %v189_v15  ;;  %vm195_vm5 = vweird.f32 %v189_v15 }
  0xcf   :  { %v333_v16 = vpop.eup %332  ;;  %v179_v46 = vmul.f32 %v178_v36, %v508_v38 }
  0xd0   :  { %v151_v19 = vmul.f32 %v333_v16, %v149_v9  ;;  %vm156_vm0 = vweird.f32 %v333_v16  ;;  %v202_v45 = vor.u32 1.1754944e-38, %v201_v37  ;;  %vm200_vm7 = vcmp.eq.f32.partialorder %v199_v41, 8.507059e+37 }
  0xd1   :  { %vm157_vm2 = vmor %vm155_vm1, %vm156_vm0 }
  0xd2   :  { %v152_v20 = vsub.f32 1.0, %v151_v19 }
  0xd4   :  { %v335_v23 = vpop.eup %334  ;;  %v153_v25 = vmul.f32 %v333_v16, %v152_v20 }
  0xd5   :  { %v191_v29 = vmul.f32 %v335_v23, %v189_v15  ;;  %vm196_vm4 = vweird.f32 %v335_v23 }
  0xd6   :  { %v154_v30 = vadd.f32 %v333_v16, %v153_v25  ;;  %vm197_vm6 = vmor %vm195_vm5, %vm196_vm4 }
  0xd7   :  { %v192_v33 = vsub.f32 1.0, %v191_v29 }
  0xd8   :  { %v158_v34 = vsel %vm157_vm2, %v333_v16, %v154_v30 }
  0xd9   :  { %v163_v39 = vsel %vm160_vm3, %v162_v32, %v158_v34  ;;  %v193_v40 = vmul.f32 %v335_v23, %v192_v33 }
  0xda   :  { %v164_v42 = vmul.f32 %v163_v39, %v139_v31 }
  0xdb   :  { %v194_v43 = vadd.f32 %v335_v23, %v193_v40 }
  0xdc   :  { %v290_v44 = vclamps-f32 %v164_v42, 1.0 }
  0xdd   :  { %v198_v28 = vsel %vm197_vm6, %v335_v23, %v194_v43 }
  0xde   :  { %v207_v48 = vadd.f32 1.0, %v290_v44  ;;  %v203_v49 = vsel %vm200_vm7, %v202_v45, %v198_v28 }
  0xdf   :  { %v204_v50 = vmul.f32 %v203_v49, %v179_v46 }
  0xe0   :  { %v209_v51 = vmul.f32 %v207_v48, %v123_v47 }
  0xe1   :  { %v291_v52 = vclamps-f32 %v204_v50, 1.0 }
  0xe2   :  { %245 = vmatmul.f32.vlgmr.msra.gmra.mxu1 %v209_v51 }
  0xe3   :  { %v208_v54 = vadd.f32 1.0, %v291_v52 }
  0xe5   :  { %v210_v55 = vmul.f32 %v208_v54, %v124_v53 }
  0xe7   :  { %248 = vmatmul.f32.vlgmr.msra.gmra.mxu3 %v210_v55 }
 0x15f   :  { %v246_v38 = vpop.f32.mrf.mxu1 }
 0x160   :  { %v265_v57 = vadd.f32 %v331_v56, %v246_v38 }
 0x162   :  { %267 = vst [vmem:[#allocation9] sm:$0xff] %v265_v57 }
 0x16a   :  { %v249_v26 = vpop.f32.mrf.mxu3 }
 0x16b   :  { %v266_v58 = vadd.f32 %v331_v56, %v249_v26 }
 0x16d   :  { %268 = vst [vmem:[#allocation9 + $0x8] sm:$0xff] %v266_v58 }
 0x16e   :  { %281 = dma.vmem_to_hbm [thread:$0]  %s274_s11, 256, %s276_s14, [#allocation5], %s439_s26, %s439_s26, %s440_s27  }
 0x16f   :  { %436 = dma.done.wait [#allocation5], 256  }
 0x170   :  { %437 = vsyncadd [#allocation5], 4294967040 }
 0x171   :  { %286 = vsyncpa [#allocation4], 1 }
 0x172   :  { %287 = vsyncpa [#allocation7], 1 }
 0x173   :  { %288 = vsyncpa [#allocation5], 1 }

</bundles_post_ra>
